<compile_context>
chip_gen: v6e
topology: v6e:2x2x1
jax: 0.10.0
libtpu: 0.0.40
codegen_flags: <defaults>
</compile_context>

<pallas_src>
import functools
import math

import jax
import jax.numpy as jnp
from jax.experimental import pallas as pl
from jax.experimental.pallas import tpu as pltpu


@functools.lru_cache(maxsize=None)
def _vmem_limit():
    """Generation-aware scoped-VMEM limit (leave headroom for compiler scratch)."""
    cap = 128 * 1024 * 1024
    try:
        info = pltpu.get_tpu_info()
        cap = int(getattr(info, "vmem_capacity_bytes", cap) or cap)
    except Exception:
        pass
    return min(int(cap * 0.8), 100 * 1024 * 1024)


# -----------------------------------------------------------------------------
# Kernels
# -----------------------------------------------------------------------------

def gn_sums_kernel(x_ref, s_ref, ss_ref):
    """Per-image per-channel sum and sum-of-squares (bf16 in, f32 accumulate).

    x_ref : (1, L, C) bf16   ->   s_ref, ss_ref : (1, 1, C) f32
    The tiny group-combine / rsqrt runs outside in plain JAX.
    """
    x = x_ref[0].astype(jnp.float32)
    s_ref[0] = jnp.sum(x, axis=0, keepdims=True)
    ss_ref[0] = jnp.sum(x * x, axis=0, keepdims=True)


def _conv3x3_fused_kernel(*refs, H, W, Cin, has_temb, has_res, has_nin, out_scale):
    """Fused: GN-affine + SiLU (once per image, bf16) -> 3x3 conv (9 flat-offset taps)
    -> epilogue (+bias [+temb] [+residual / NIN 1x1] [*1/sqrt(2)]).

    Refs: x (1,HW,Cin) bf16, w (9,Cin,tn) bf16, b (1,1,tn) f32,
          gn_scale (1,1,Cin) f32, gn_shift (1,1,Cin) f32,
          [temb (1,1,tn) f32], [residual (1,HW,Cres) bf16], [nin_w (Cres,tn) bf16,
          nin_b (1,1,tn) f32], out (1,HW,tn), ypad scratch ((H+3)*Wp, Cin) bf16.
    """
    it = iter(refs)
    x_ref = next(it)
    w_ref = next(it)
    b_ref = next(it)
    sc_ref = next(it)
    sh_ref = next(it)
    temb_ref = next(it) if has_temb else None
    res_ref = next(it) if has_res else None
    ninw_ref = next(it) if has_nin else None
    ninb_ref = next(it) if has_nin else None
    o_ref = next(it)
    ypad_ref = next(it)                       # flat, zero-haloed activation scratch

    Wp = W + 2
    M = H * Wp                                # rows fed to each tap matmul
    tn = o_ref.shape[-1]

    # ---- prologue: once per image (Cout-tile axis is "arbitrary", scratch persists) ---
    @pl.when(pl.program_id(1) == 0)
    def _():
        ypad_ref[...] = jnp.zeros_like(ypad_ref)              # halo + pad rows = 0
        y = x_ref[0].astype(jnp.float32) * sc_ref[0] + sh_ref[0]
        y = (y * jax.nn.sigmoid(y)).astype(jnp.bfloat16)      # SiLU, single bf16 cast
        for i in range(H):                                    # interior rows, stride Wp
            ypad_ref[pl.ds((i + 1) * Wp + 1, W), :] = y[i * W:(i + 1) * W, :]

    # ---- 3x3 conv: 9 contiguous flat-offset slices, f32 accumulation on the MXU ----
    acc = jnp.zeros((M, tn), jnp.float32)
    t = 0
    for ky in range(3):
        for kx in range(3):
            acc = acc + jnp.dot(ypad_ref[pl.ds(ky * Wp + kx, M), :], w_ref[t],
                                preferred_element_type=jnp.float32)
            t += 1

    # ---- epilogue: bias, temb, shortcut (identity or NIN), skip rescale ----
    add = b_ref[0]                                            # (1, tn) f32
    if has_temb:
        add = add + temb_ref[0]
    res = None
    if has_res:
        if has_nin:
            res = jnp.dot(res_ref[0], ninw_ref[...],
                          preferred_element_type=jnp.float32) + ninb_ref[0]
        else:
            res = res_ref[0].astype(jnp.float32)
    for i in range(H):                                        # drop the 2 pad columns
        row = acc[i * Wp:i * Wp + W, :] + add
        if res is not None:
            row = row + res[i * W:(i + 1) * W, :]
        if out_scale != 1.0:
            row = row * out_scale
        o_ref[0, pl.ds(i * W, W), :] = row.astype(o_ref.dtype)


# -----------------------------------------------------------------------------
# Pallas wrappers
# -----------------------------------------------------------------------------

def _cout_tile(cout):
    """Cout tile: full extent for small channel counts, else a lane-dense 128-multiple."""
    if cout > 256 and cout % 128 == 0:
        for tn in (256, 128):
            if cout % tn == 0:
                return tn
    return cout


def gn_scale_shift(x_bf, gamma, beta, groups, eps=1e-6):
    """x_bf: (N, L, C) bf16 -> per-image per-channel (scale, shift), each (N, 1, C) f32."""
    N, L, C = x_bf.shape
    s, ss = pl.pallas_call(
        gn_sums_kernel,
        out_shape=(jax.ShapeDtypeStruct((N, 1, C), jnp.float32),
                   jax.ShapeDtypeStruct((N, 1, C), jnp.float32)),
        grid=(N,),
        in_specs=[pl.BlockSpec((1, L, C), lambda n: (n, 0, 0))],
        out_specs=(pl.BlockSpec((1, 1, C), lambda n: (n, 0, 0)),
                   pl.BlockSpec((1, 1, C), lambda n: (n, 0, 0))),
        compiler_params=pltpu.CompilerParams(
            dimension_semantics=("parallel",),
            vmem_limit_bytes=_vmem_limit()),
    )(x_bf)

    # Tiny (N, C) group-combine in plain JAX (negligible cost).
    cg = C // groups
    cnt = float(cg * L)
    sg = s.reshape(N, groups, cg).sum(-1, keepdims=True)
    ssg = ss.reshape(N, groups, cg).sum(-1, keepdims=True)
    mean = sg / cnt
    var = jnp.maximum(ssg / cnt - mean * mean, 0.0)
    inv = jax.lax.rsqrt(var + eps)
    mean = jnp.broadcast_to(mean, (N, groups, cg)).reshape(N, 1, C)
    inv = jnp.broadcast_to(inv, (N, groups, cg)).reshape(N, 1, C)
    scale = gamma.reshape(1, 1, C).astype(jnp.float32) * inv
    shift = beta.reshape(1, 1, C).astype(jnp.float32) - mean * scale
    return scale, shift


def conv3x3_gn_act(x_bf, H, W, w, b, gn_scale, gn_shift, *, temb_add=None,
                   residual=None, nin_w=None, nin_b=None, skip_rescale=False,
                   out_dtype=jnp.float32):
    """Fused GN+SiLU -> 3x3 conv (+bias, +temb, +shortcut).  Returns (N, H*W, Cout).

    x_bf      : (N, H*W, Cin) bf16 unpadded input (padding is done in-kernel)
    w         : (3, 3, Cin, Cout) f32
    gn_scale/gn_shift : (N, 1, Cin) f32
    temb_add  : (N, 1, Cout) f32 or None
    residual  : (N, H*W, Cres) bf16 or None   (Cres = Cin for NIN, Cout for identity)
    """
    N, HW, Cin = x_bf.shape
    assert HW == H * W
    Cout = w.shape[-1]
    tn = _cout_tile(Cout)
    nj = Cout // tn
    Wp = W + 2
    padrows = (H + 3) * Wp                    # covers max tap offset 2*Wp+2 + H*Wp rows

    wf = w.reshape(9, Cin, Cout).astype(jnp.bfloat16)
    b3 = b.reshape(1, 1, Cout).astype(jnp.float32)

    has_temb = temb_add is not None
    has_res = residual is not None
    has_nin = nin_w is not None
    out_scale = (1.0 / math.sqrt(2.0)) if (has_res and skip_rescale) else 1.0

    kernel = functools.partial(
        _conv3x3_fused_kernel, H=H, W=W, Cin=Cin,
        has_temb=has_temb, has_res=has_res, has_nin=has_nin, out_scale=out_scale)

    in_arrays = [x_bf, wf, b3, gn_scale, gn_shift]
    in_specs = [
        pl.BlockSpec((1, HW, Cin), lambda n, j: (n, 0, 0)),   # resident across j tiles
        pl.BlockSpec((9, Cin, tn), lambda n, j: (0, 0, j)),
        pl.BlockSpec((1, 1, tn), lambda n, j: (0, 0, j)),
        pl.BlockSpec((1, 1, Cin), lambda n, j: (n, 0, 0)),
        pl.BlockSpec((1, 1, Cin), lambda n, j: (n, 0, 0)),
    ]
    if has_temb:
        in_arrays.append(temb_add)
        in_specs.append(pl.BlockSpec((1, 1, tn), lambda n, j: (n, 0, j)))
    if has_res:
        in_arrays.append(residual)
        if has_nin:
            Cres = residual.shape[-1]
            in_specs.append(pl.BlockSpec((1, HW, Cres), lambda n, j: (n, 0, 0)))
        else:
            in_specs.append(pl.BlockSpec((1, HW, tn), lambda n, j: (n, 0, j)))
    if has_nin:
        in_arrays.append(nin_w.astype(jnp.bfloat16))
        in_specs.append(pl.BlockSpec((nin_w.shape[0], tn), lambda n, j: (0, j)))
        in_arrays.append(nin_b.reshape(1, 1, Cout).astype(jnp.float32))
        in_specs.append(pl.BlockSpec((1, 1, tn), lambda n, j: (0, 0, j)))

    # n is the core-split axis; j must stay sequential so the activation scratch
    # written at j==0 can be reused by the later Cout tiles.
    return pl.pallas_call(
        kernel,
        out_shape=jax.ShapeDtypeStruct((N, HW, Cout), out_dtype),
        grid=(N, nj),
        in_specs=in_specs,
        out_specs=pl.BlockSpec((1, HW, tn), lambda n, j: (n, 0, j)),
        scratch_shapes=[pltpu.VMEM((padrows, Cin), jnp.bfloat16)],
        compiler_params=pltpu.CompilerParams(
            dimension_semantics=("parallel", "arbitrary"),
            vmem_limit_bytes=_vmem_limit()),
    )(*in_arrays)


# -----------------------------------------------------------------------------
# Module forward (act = SiLU, conv_shortcut=False, dropout inactive / eval mode)
# -----------------------------------------------------------------------------

def resnet_block_ddpmpp_forward(params, x_nchw, temb=None, *, skip_rescale=False):
    # TODO(synk): NCHW<->NHWC transposes kept at the boundary to preserve the PyTorch
    #             module contract; drop them if the surrounding model is NHWC end-to-end.
    x = jnp.transpose(x_nchw, (0, 2, 3, 1)).astype(jnp.float32)     # NCHW -> NHWC
    N, H, W, in_ch = x.shape
    out_ch = params["conv0_w"].shape[-1]
    g0 = min(in_ch // 4, 32)
    g1 = min(out_ch // 4, 32)

    # Single bf16 copy of x: GN_0 stats input, Conv_0 input, and the shortcut residual.
    x_bf = x.reshape(N, H * W, in_ch).astype(jnp.bfloat16)

    # GroupNorm_0: stats only (normalize + SiLU fused into Conv_0's input path).
    sc0, sh0 = gn_scale_shift(x_bf, params["gn0_gamma"], params["gn0_beta"], g0)

    # Dense_0(act(temb)) — tiny, plain JAX, folded into Conv_0's epilogue.
    tproj = None
    if temb is not None:
        t = temb.astype(jnp.float32)
        t = t * jax.nn.sigmoid(t)
        tproj = (t @ params["dense0_w"] + params["dense0_b"]).reshape(N, 1, out_ch)

    # h = Conv_0(act(GN_0(x))) + temb_proj     (kept bf16 to halve HBM traffic)
    h = conv3x3_gn_act(x_bf, H, W, params["conv0_w"], params["conv0_b"], sc0, sh0,
                       temb_add=tproj, out_dtype=jnp.bfloat16)      # (N, HW, out_ch)

    # GroupNorm_1 stats.  TODO(synk): Dropout_0 treated as identity (eval mode).
    sc1, sh1 = gn_scale_shift(h, params["gn1_gamma"], params["gn1_beta"], g1)

    # out = Conv_1(act(GN_1(h))) + shortcut(x)  [fused epilogue], optional / sqrt(2)
    if in_ch != out_ch:
        # TODO(synk): conv_shortcut=True (Conv_2 shortcut) not implemented; NIN path only.
        out = conv3x3_gn_act(h, H, W, params["conv1_w"], params["conv1_b"], sc1, sh1,
                             residual=x_bf, nin_w=params["nin_w"], nin_b=params["nin_b"],
                             skip_rescale=skip_rescale, out_dtype=jnp.float32)
    else:
        out = conv3x3_gn_act(h, H, W, params["conv1_w"], params["conv1_b"], sc1, sh1,
                             residual=x_bf, skip_rescale=skip_rescale,
                             out_dtype=jnp.float32)

    out = out.reshape(N, H, W, out_ch)
    return jnp.transpose(out, (0, 3, 1, 2))                         # NHWC -> NCHW


# -----------------------------------------------------------------------------
# Deterministic parameter init (mirrors default_init: fan_avg / uniform)
# -----------------------------------------------------------------------------

def _vs_uniform(key, shape, fan_in, fan_out, scale=1.0):
    scale = max(scale, 1e-10)
    var = scale / ((fan_in + fan_out) / 2.0)
    lim = math.sqrt(3.0 * var)
    return jax.random.uniform(key, shape, jnp.float32, -lim, lim)


def init_params(key, in_ch, out_ch, temb_dim):
    k0, k1, k2, k3 = jax.random.split(key, 4)
    return dict(
        gn0_gamma=jnp.ones((in_ch,), jnp.float32),
        gn0_beta=jnp.zeros((in_ch,), jnp.float32),
        conv0_w=_vs_uniform(k0, (3, 3, in_ch, out_ch), in_ch * 9, out_ch * 9, 1.0),
        conv0_b=jnp.zeros((out_ch,), jnp.float32),
        dense0_w=_vs_uniform(k1, (temb_dim, out_ch), temb_dim, out_ch, 1.0),
        dense0_b=jnp.zeros((out_ch,), jnp.float32),
        gn1_gamma=jnp.ones((out_ch,), jnp.float32),
        gn1_beta=jnp.zeros((out_ch,), jnp.float32),
        conv1_w=_vs_uniform(k2, (3, 3, out_ch, out_ch), out_ch * 9, out_ch * 9, 1e-10),  # init_scale=0
        conv1_b=jnp.zeros((out_ch,), jnp.float32),
        nin_w=_vs_uniform(k3, (in_ch, out_ch), out_ch, in_ch, 0.1),
        nin_b=jnp.zeros((out_ch,), jnp.float32),
    )


if __name__ == "__main__":
    key = jax.random.PRNGKey(0)
    kx, kt, kp = jax.random.split(key, 3)

    N, in_ch, H, W = 2, 4, 16, 16
    out_ch, temb_dim = 8, 32

    x = jax.random.normal(kx, (N, in_ch, H, W), jnp.float32)   # NCHW, like PyTorch
    temb = jax.random.normal(kt, (N, temb_dim), jnp.float32)
    params = init_params(kp, in_ch, out_ch, temb_dim)

    out = resnet_block_ddpmpp_forward(params, x, temb, skip_rescale=False)
    out = jax.block_until_ready(out)
    assert out.shape == (N, out_ch, H, W), out.shape
    assert bool(jnp.all(jnp.isfinite(out)))
    print("KERNEL_OK")
</pallas_src>

<mosaic_0001>
module attributes {stable_mosaic.version = 11 : i64} {
  func.func @gn_sums_kernel(%arg0: i32, %arg1: memref<1x256x4xbf16, #tpu.memory_space<vmem>>, %arg2: memref<1x1x4xf32, #tpu.memory_space<vmem>>, %arg3: memref<1x1x4xf32, #tpu.memory_space<vmem>>) attributes {dimension_semantics = [#tpu.dimension_semantics<parallel>], iteration_bounds = array<i64: 2>, scalar_prefetch = 0 : i64, scratch_operands = 0 : i64, tpu.core_type = #tpu.core_type<tc>, window_params = [{transform_indices = @transform_0, window_bounds = array<i64: 1, 256, 4>}, {transform_indices = @transform_1, window_bounds = array<i64: 1, 1, 4>}, {transform_indices = @transform_2, window_bounds = array<i64: 1, 1, 4>}]} {
    %c0 = arith.constant 0 : index
    %c0_0 = arith.constant 0 : index
    %c0_1 = arith.constant 0 : index
    %0 = vector.load %arg1[%c0, %c0_0, %c0_1] : memref<1x256x4xbf16, #tpu.memory_space<vmem>>, vector<1x256x4xbf16>
    %1 = vector.shape_cast %0 : vector<1x256x4xbf16> to vector<256x4xbf16>
    %2 = arith.extf %1 : vector<256x4xbf16> to vector<256x4xf32>
    %cst = arith.constant dense<0.000000e+00> : vector<4xf32>
    %3 = vector.multi_reduction <add>, %2, %cst [0] : vector<256x4xf32> to vector<4xf32>
    %4 = vector.shape_cast %3 : vector<4xf32> to vector<1x4xf32>
    %c0_2 = arith.constant 0 : index
    %c0_3 = arith.constant 0 : index
    %c0_4 = arith.constant 0 : index
    %5 = vector.load %arg2[%c0_2, %c0_3, %c0_4] : memref<1x1x4xf32, #tpu.memory_space<vmem>>, vector<1x1x4xf32>
    %6 = vector.shape_cast %5 : vector<1x1x4xf32> to vector<1x4xf32>
    %7 = vector.shape_cast %4 : vector<1x4xf32> to vector<1x1x4xf32>
    tpu.vector_store %arg2[%c0_2, %c0_3, %c0_4], %7 {strides = array<i32>} : memref<1x1x4xf32, #tpu.memory_space<vmem>>, vector<1x1x4xf32>,
    %8 = arith.mulf %2, %2 : vector<256x4xf32>
    %cst_5 = arith.constant dense<0.000000e+00> : vector<4xf32>
    %9 = vector.multi_reduction <add>, %8, %cst_5 [0] : vector<256x4xf32> to vector<4xf32>
    %10 = vector.shape_cast %9 : vector<4xf32> to vector<1x4xf32>
    %c0_6 = arith.constant 0 : index
    %c0_7 = arith.constant 0 : index
    %c0_8 = arith.constant 0 : index
    %11 = vector.load %arg3[%c0_6, %c0_7, %c0_8] : memref<1x1x4xf32, #tpu.memory_space<vmem>>, vector<1x1x4xf32>
    %12 = vector.shape_cast %11 : vector<1x1x4xf32> to vector<1x4xf32>
    %13 = vector.shape_cast %10 : vector<1x4xf32> to vector<1x1x4xf32>
    tpu.vector_store %arg3[%c0_6, %c0_7, %c0_8], %13 {strides = array<i32>} : memref<1x1x4xf32, #tpu.memory_space<vmem>>, vector<1x1x4xf32>,
    return
  }
  func.func @transform_0(%arg0: i32) -> (i32, i32, i32) {
    %c0_i32 = arith.constant 0 : i32
    %c0_i32_0 = arith.constant 0 : i32
    %c0_i32_1 = arith.constant 0 : i32
    return %arg0, %c0_i32, %c0_i32_0 : i32, i32, i32
  }
  func.func @transform_1(%arg0: i32) -> (i32, i32, i32) {
    %c0_i32 = arith.constant 0 : i32
    %c0_i32_0 = arith.constant 0 : i32
    %c0_i32_1 = arith.constant 0 : i32
    return %arg0, %c0_i32, %c0_i32_0 : i32, i32, i32
  }
  func.func @transform_2(%arg0: i32) -> (i32, i32, i32) {
    %c0_i32 = arith.constant 0 : i32
    %c0_i32_0 = arith.constant 0 : i32
    %c0_i32_1 = arith.constant 0 : i32
    return %arg0, %c0_i32, %c0_i32_0 : i32, i32, i32
  }
}

</mosaic_0001>

<bundles_post_ra>
// kernel: tpu_custom_call.1
= control target key start
LH: loop header
LB: loop body
LE: loop exit
PB: predicated region body
PF: predicated region fallthrough
CT: control target
= control target key end

     0   :  { %8 = vsyncpa [#allocation3], 0  ;;  %s959_s0 = inlined_call_operand.vmem [shape: bf16[2,256,4], index: 0, kind: input, shape index: {}]   ;;  %s960_s1 = inlined_call_operand.hbm [shape: f32[2,1,4], index: 1, kind: output, shape index: {0}]   ;;  %s961_s2 = inlined_call_operand.hbm [shape: f32[2,1,4], index: 2, kind: output, shape index: {1}]  }
   0x1   :  { %10 = vsyncpa [#allocation3 + $0x1], 0 }
   0x2   :  { %11 = vsyncpa [#allocation5], 0 }
   0x3   :  { %13 = vsyncpa [#allocation5 + $0x1], 0  ;;  %s745_s9 = smov 0   ;;  %s747_s10 = smov 0  }
   0x4   :  { %s749_s11 = smov 0   ;;  %s751_s12 = smov 0  }
   0x5 LB: > { %s766_s13 = sadd.s32 4294967295, %s726_s12   ;;  %s502_s14 = sadd.s32 4294967294, %s726_s12   ;;  %s726_s12 = sphi %s751_s12, %s967_s12   ;;  %s722_s11 = sphi %s749_s11, %s966_s11   ;;  %s718_s10 = sphi %s747_s10, %s965_s10   ;;  %s714_s9 = sphi %s745_s9, %s964_s9  }
   0x6   : > { %s770_s15 = sadd.s32 1, %s726_s12   ;;  %s52_s16 = sadd.s32 1, %s722_s11 }
   0x7   : > { %s49_s17 = ssub.s32 %s726_s12, %s770_s15  ;;  %p62_p0 = scmp.ne.s32.totalorder %s722_s11, %s718_s10 }
   0x8   : > { %p50_p1 = scmp.eq.s32.totalorder %s49_s17, 0  ;;  %p63_p2 = scmp.eq.s32.totalorder %s766_s13, 1 }
   0x9   : > { %p68_p3 = scmp.ne.s32.totalorder %s718_s10, %s714_s9  ;;  %p69_p4 = scmp.eq.s32.totalorder %s502_s14, 1 }
   0xa   : > { %s781_s18 = scalar_select %p50_p1, %s722_s11, %s52_s16  }
   0xb   : > { %p783_p5 = por %p63_p2, %p62_p0  ;;  %p787_p6 = por %p69_p4, %p68_p3 }
   0xc   : > { %p505_p7 = scmp.ge.s32.totalorder %s726_s12, 1  ;;  %p121_p8 = scmp.lt.s32.totalorder %s726_s12, 3 }
   0xe   : > { %p122_p9 = pnand %p505_p7, %p121_p8 }
   0xf   : > { %p146_p10 = scmp.lt.s32.totalorder (!%p122_p9), %s766_s13, 1  ;;  %s874_s26 = sand.u32 (!%p122_p9), 1, %s718_s10  }
  0x10   : > { %125 = sbr.rel (%p122_p9) target bundleno = 144 (0x90), region = 24  ;;  %s139_s27 = scalar_lea.vmem (!%p122_p9), [#allocation2], %s874_s26 }
  0x11   : > { %s406_s28 = sshll.u32 (!%p122_p9), %s139_s27, 4  ;;  %s508_s29 = sshll.u32 (!%p122_p9), %s766_s13, 4  ;;  %s882_s28 = int_to_ptr.vmem [resolvable:$true] %s406_s28 }
  0x12   : > { %s890_s4 = scalar_lea.hbm (!%p122_p9), %s960_s1, %s508_s29  ;;  %s390_s5 = scalar_lea.sflag (!%p122_p9), [#allocation3], %s874_s26 }
  0x13   : > { %s636_s6 = scalar_lea.vmem (!%p122_p9), %s882_s28, 16  ;;  %s728_s7 = smov (!%p122_p9), [#allocation2]  }
  0x14   : > { %p637_p11 = scmp.ne.s32.totalorder (!%p122_p9), %s882_s28, %s636_s6  ;;  %s640_s8 = sshll.u32 (!%p122_p9), %s728_s7, 4  ;;  %s641_s8 = int_to_ptr.vmem [resolvable:$false] %s640_s8 }
  0x15   : > { %s147_s21 = scalar_select %p146_p10, %s766_s13, 1  ;;  %vm215_vm0 = vcmask 31744   ;;  %vm285_vm1 = vcmask 24576  }
  0x16   : > { %p638_p12 = pnand %p637_p11, %p783_p5  ;;  %s642_s14 = scalar_lea.vmem %s641_s8, 32 }
  0x17   : > { %s512_s22 = sshll.u32 %s147_s21, 7  ;;  %p643_p0 = scmp.lt.s32.totalorder %s882_s28, %s641_s8 }
  0x18   : > { %s798_s25 = scalar_lea.vmem %s959_s0, %s512_s22  ;;  %p639_p13 = pneg %p638_p12 }
  0x19   : > { %v514_v0 = vld [vmem:[%s798_s25] sm:$0xff]   ;;  %v577_v1 = vld [vmem:[%s798_s25 + $0x8] sm:$0xff]   ;;  %v578_v5 = vld [vmem:[%s798_s25 + $0x10] sm:$0xff]   ;;  %p644_p1 = scmp.lt.s32.totalorder %s642_s14, %s636_s6 }
  0x1a   : > { %v515_v2 = vunpack.c.l.bf16 %v514_v0  ;;  %v516_v3 = vunpack.c.h.bf16 %v514_v0  ;;  %v519_v4 = vunpack.c.l.bf16 %v577_v1  ;;  %v520_v6 = vunpack.c.h.bf16 %v577_v1  ;;  %v579_v13 = vld [vmem:[%s798_s25 + $0x18] sm:$0xff]   ;;  %v580_v20 = vld [vmem:[%s798_s25 + $0x20] sm:$0xff]   ;;  %v581_v26 = vld [vmem:[%s798_s25 + $0x28] sm:$0xff]  }
  0x1b   : > { %v523_v11 = vunpack.c.l.bf16 %v578_v5  ;;  %v524_v15 = vunpack.c.h.bf16 %v578_v5  ;;  %v527_v18 = vunpack.c.l.bf16 %v579_v13  ;;  %v528_v22 = vunpack.c.h.bf16 %v579_v13  ;;  %v582_v33 = vld [vmem:[%s798_s25 + $0x30] sm:$0xff]   ;;  %v583_v49 = vld [vmem:[%s798_s25 + $0x38] sm:$0xff]   ;;  %v584_v62 = vld [vmem:[%s798_s25 + $0x40] sm:$0xff]   ;;  %p645_p2 = por %p644_p1, %p643_p0 }
  0x1c   : > { %v216_v7 = vsel %vm215_vm0, %v515_v2, 0.0  ;;  %v217_v8 = vsel %vm215_vm0, %v516_v3, 0.0  ;;  %v219_v9 = vsel %vm215_vm0, %v519_v4, 0.0  ;;  %v221_v12 = vsel %vm215_vm0, %v520_v6, 0.0 }
  0x1d   : > { %v218_v10 = vadd.f32 %v217_v8, %v216_v7  ;;  %v223_v16 = vsel %vm215_vm0, %v523_v11, 0.0  ;;  %v225_v19 = vsel %vm215_vm0, %v524_v15, 0.0  ;;  %v227_v23 = vsel %vm215_vm0, %v527_v18, 0.0  ;;  %p646_p3 = pnand %p645_p2, %p639_p13 }
  0x1e   : > { %v531_v25 = vunpack.c.l.bf16 %v580_v20  ;;  %v229_v27 = vsel %vm215_vm0, %v528_v22, 0.0  ;;  %v532_v29 = vunpack.c.h.bf16 %v580_v20  ;;  %v535_v31 = vunpack.c.l.bf16 %v581_v26 }
  0x1f   : > { %v220_v14 = vadd.f32 %v219_v9, %v218_v10  ;;  %v287_v35 = vmul.f32 %v515_v2, %v515_v2  ;;  %v288_v36 = vmul.f32 %v516_v3, %v516_v3  ;;  %v289_v37 = vmul.f32 %v519_v4, %v519_v4 }
  0x20   : > { %v231_v30 = vsel %vm215_vm0, %v531_v25, 0.0  ;;  %v233_v34 = vsel %vm215_vm0, %v532_v29, 0.0  ;;  %v536_v38 = vunpack.c.h.bf16 %v581_v26  ;;  %v235_v40 = vsel %vm215_vm0, %v535_v31, 0.0 }
  0x21   : > { %v222_v17 = vadd.f32 %v221_v12, %v220_v14  ;;  %v290_v41 = vmul.f32 %v520_v6, %v520_v6  ;;  %v539_v42 = vunpack.c.l.bf16 %v582_v33  ;;  %v291_v45 = vmul.f32 %v523_v11, %v523_v11  ;;  %v585_v11 = vld [vmem:[%s798_s25 + $0x48] sm:$0xff]  }
  0x22   : > { %v237_v44 = vsel %vm215_vm0, %v536_v38, 0.0  ;;  %v319_v46 = vsel %vm215_vm0, %v287_v35, 0.0  ;;  %v320_v47 = vsel %vm215_vm0, %v288_v36, 0.0  ;;  %v322_v48 = vsel %vm215_vm0, %v289_v37, 0.0  ;;  %v587_v37 = vld [vmem:[%s798_s25 + $0x58] sm:$0xff]  }
  0x23   : > { %v224_v21 = vadd.f32 %v223_v16, %v222_v17  ;;  %v321_v51 = vadd.f32 %v320_v47, %v319_v46  ;;  %v540_v52 = vunpack.c.h.bf16 %v582_v33  ;;  %v239_v53 = vsel %vm215_vm0, %v539_v42, 0.0 }
  0x24   : > { %v292_v54 = vmul.f32 %v524_v15, %v524_v15  ;;  %v324_v55 = vsel %vm215_vm0, %v290_v41, 0.0  ;;  %v543_v58 = vunpack.c.l.bf16 %v583_v49  ;;  %v293_v60 = vmul.f32 %v527_v18, %v527_v18 }
  0x25   : > { %v226_v24 = vadd.f32 %v225_v19, %v224_v21  ;;  %v323_v57 = vadd.f32 %v322_v48, %v321_v51  ;;  %v241_v59 = vsel %vm215_vm0, %v540_v52, 0.0  ;;  %v326_v61 = vsel %vm215_vm0, %v291_v45, 0.0 }
  0x26   : > { %v544_v1 = vunpack.c.h.bf16 %v583_v49  ;;  %v243_v2 = vsel %vm215_vm0, %v543_v58, 0.0  ;;  %v294_v3 = vmul.f32 %v528_v22, %v528_v22  ;;  %v328_v4 = vsel %vm215_vm0, %v292_v54, 0.0 }
  0x27   : > { %v228_v28 = vadd.f32 %v227_v23, %v226_v24  ;;  %v325_v0 = vadd.f32 %v324_v55, %v323_v57  ;;  %v547_v7 = vunpack.c.l.bf16 %v584_v62  ;;  %v295_v9 = vmul.f32 %v531_v25, %v531_v25  ;;  %v586_v24 = vld [vmem:[%s798_s25 + $0x50] sm:$0xff]  }
  0x28   : > { %v245_v8 = vsel %vm215_vm0, %v544_v1, 0.0  ;;  %v330_v10 = vsel %vm215_vm0, %v293_v60, 0.0  ;;  %v548_v14 = vunpack.c.h.bf16 %v584_v62  ;;  %v296_v16 = vmul.f32 %v532_v29, %v532_v29 }
  0x29   : > { %v230_v32 = vadd.f32 %v229_v27, %v228_v28  ;;  %v327_v6 = vadd.f32 %v326_v61, %v325_v0  ;;  %v247_v15 = vsel %vm215_vm0, %v547_v7, 0.0  ;;  %v332_v17 = vsel %vm215_vm0, %v294_v3, 0.0 }
  0x2a   : > { %v551_v20 = vunpack.c.l.bf16 %v585_v11  ;;  %v249_v21 = vsel %vm215_vm0, %v548_v14, 0.0  ;;  %v297_v22 = vmul.f32 %v535_v31, %v535_v31  ;;  %v334_v23 = vsel %vm215_vm0, %v295_v9, 0.0 }
  0x2b   : > { %v232_v39 = vadd.f32 %v231_v30, %v230_v32  ;;  %v329_v13 = vadd.f32 %v328_v4, %v327_v6  ;;  %v552_v27 = vunpack.c.h.bf16 %v585_v11  ;;  %v298_v30 = vmul.f32 %v536_v38, %v536_v38 }
  0x2c   : > { %v251_v28 = vsel %vm215_vm0, %v551_v20, 0.0  ;;  %v336_v29 = vsel %vm215_vm0, %v296_v16, 0.0  ;;  %v299_v36 = vmul.f32 %v539_v42, %v539_v42  ;;  %v338_v31 = vsel %vm215_vm0, %v297_v22, 0.0 }
  0x2d   : > { %v234_v43 = vadd.f32 %v233_v34, %v232_v39  ;;  %v331_v19 = vadd.f32 %v330_v10, %v329_v13  ;;  %v555_v34 = vunpack.c.l.bf16 %v586_v24  ;;  %v253_v35 = vsel %vm215_vm0, %v552_v27, 0.0 }
  0x2e   : > { %v556_v41 = vunpack.c.h.bf16 %v586_v24  ;;  %v340_v38 = vsel %vm215_vm0, %v298_v30, 0.0  ;;  %v559_v47 = vunpack.c.l.bf16 %v587_v37  ;;  %v301_v49 = vmul.f32 %v543_v58, %v543_v58 }
  0x2f   : > { %v236_v50 = vadd.f32 %v235_v40, %v234_v43  ;;  %v333_v26 = vadd.f32 %v332_v17, %v331_v19  ;;  %v255_v43 = vsel %vm215_vm0, %v555_v34, 0.0  ;;  %v342_v42 = vsel %vm215_vm0, %v299_v36, 0.0 }
  0x30   : > { %v257_v48 = vsel %vm215_vm0, %v556_v41, 0.0  ;;  %v560_v54 = vunpack.c.h.bf16 %v587_v37  ;;  %v259_v55 = vsel %vm215_vm0, %v559_v47, 0.0  ;;  %v303_v62 = vmul.f32 %v547_v7, %v547_v7 }
  0x31   : > { %v238_v56 = vadd.f32 %v237_v44, %v236_v50  ;;  %v335_v33 = vadd.f32 %v334_v23, %v333_v26  ;;  %v300_v44 = vmul.f32 %v540_v52, %v540_v52  ;;  %v588_v50 = vld [vmem:[%s798_s25 + $0x60] sm:$0xff]   ;;  %v346_v58 = vsel %vm215_vm0, %v301_v49, 0.0 }
  0x32   : > { %v563_v60 = vunpack.c.l.bf16 %v588_v50  ;;  %v261_v61 = vsel %vm215_vm0, %v560_v54, 0.0  ;;  %v564_v3 = vunpack.c.h.bf16 %v588_v50  ;;  %v305_v11 = vmul.f32 %v551_v20, %v551_v20  ;;  %v591_v20 = vld [vmem:[%s798_s25 + $0x78] sm:$0xff]  }
  0x33   : > { %v240_v63 = vadd.f32 %v239_v53, %v238_v56  ;;  %v337_v40 = vadd.f32 %v336_v29, %v335_v33  ;;  %v302_v56 = vmul.f32 %v544_v1, %v544_v1  ;;  %v344_v52 = vsel %vm215_vm0, %v300_v44, 0.0 }
  0x34   : > { %v263_v4 = vsel %vm215_vm0, %v563_v60, 0.0  ;;  %v265_v10 = vsel %vm215_vm0, %v564_v3, 0.0  ;;  %v350_v7 = vsel %vm215_vm0, %v303_v62, 0.0  ;;  %v307_v24 = vmul.f32 %v555_v34, %v555_v34 }
  0x35   : > { %v242_v5 = vadd.f32 %v241_v59, %v240_v63  ;;  %v339_v46 = vadd.f32 %v338_v31, %v337_v40  ;;  %v589_v63 = vld [vmem:[%s798_s25 + $0x68] sm:$0xff]   ;;  %v348_v1 = vsel %vm215_vm0, %v302_v56, 0.0  ;;  %v575_v36 = vunpack.c.l.bf16 %v591_v20 }
  0x36   : > { %v567_v9 = vunpack.c.l.bf16 %v589_v63  ;;  %v568_v16 = vunpack.c.h.bf16 %v589_v63  ;;  %v309_v37 = vmul.f32 %v559_v47, %v559_v47  ;;  %v311_v49 = vmul.f32 %v563_v60, %v563_v60 }
  0x37   : > { %v244_v12 = vadd.f32 %v243_v2, %v242_v5  ;;  %v341_v53 = vadd.f32 %v340_v38, %v339_v46  ;;  %v304_v5 = vmul.f32 %v548_v14, %v548_v14  ;;  %v275_v44 = vsel %vm215_vm0, %v575_v36, 0.0 }
  0x38   : > { %v267_v17 = vsel %vm215_vm0, %v567_v9, 0.0  ;;  %v269_v23 = vsel %vm215_vm0, %v568_v16, 0.0  ;;  %v310_v38 = vmul.f32 %v560_v54, %v560_v54 }
  0x39   : > { %v246_v18 = vadd.f32 %v245_v8, %v244_v12  ;;  %v343_v59 = vadd.f32 %v342_v42, %v341_v53  ;;  %v590_v12 = vld [vmem:[%s798_s25 + $0x70] sm:$0xff]   ;;  %v352_v14 = vsel %vm215_vm0, %v304_v5, 0.0  ;;  %v362_v42 = vsel %vm215_vm0, %v309_v37, 0.0 }
  0x3a   : > { %v571_v22 = vunpack.c.l.bf16 %v590_v12  ;;  %v572_v30 = vunpack.c.h.bf16 %v590_v12  ;;  %v364_v53 = vsel %vm215_vm0, %v310_v38, 0.0 }
  0x3b   : > { %v248_v25 = vadd.f32 %v247_v15, %v246_v18  ;;  %v345_v2 = vadd.f32 %v344_v52, %v343_v59  ;;  %v306_v18 = vmul.f32 %v552_v27, %v552_v27  ;;  %v313_v52 = vmul.f32 %v567_v9, %v567_v9 }
  0x3c   : > { %v271_v29 = vsel %vm215_vm0, %v571_v22, 0.0  ;;  %v273_v31 = vsel %vm215_vm0, %v572_v30, 0.0  ;;  %v315_v63 = vmul.f32 %v571_v22, %v571_v22 }
  0x3d   : > { %v250_v32 = vadd.f32 %v249_v21, %v248_v25  ;;  %v347_v8 = vadd.f32 %v346_v58, %v345_v2  ;;  %v354_v25 = vsel %vm215_vm0, %v305_v11, 0.0  ;;  %v356_v33 = vsel %vm215_vm0, %v306_v18, 0.0 }
  0x3e   : > { %v374_v9 = vsel %vm215_vm0, %v315_v63, 0.0 }
  0x3f   : > { %v252_v39 = vadd.f32 %v251_v28, %v250_v32  ;;  %v349_v15 = vadd.f32 %v348_v1, %v347_v8  ;;  %v308_v32 = vmul.f32 %v556_v41, %v556_v41  ;;  %v317_v8 = vmul.f32 %v575_v36, %v575_v36 }
  0x41   : > { %v254_v45 = vadd.f32 %v253_v35, %v252_v39  ;;  %v351_v21 = vadd.f32 %v350_v7, %v349_v15  ;;  %v358_v39 = vsel %vm215_vm0, %v307_v24, 0.0 }
  0x43   : > { %v256_v51 = vadd.f32 %v255_v43, %v254_v45  ;;  %v353_v28 = vadd.f32 %v352_v14, %v351_v21  ;;  %v576_v43 = vunpack.c.h.bf16 %v591_v20  ;;  %v360_v45 = vsel %vm215_vm0, %v308_v32, 0.0 }
  0x45   : > { %v258_v57 = vadd.f32 %v257_v48, %v256_v51  ;;  %v355_v35 = vadd.f32 %v354_v25, %v353_v28  ;;  %v277_v48 = vsel %vm215_vm0, %v576_v43, 0.0  ;;  %v312_v51 = vmul.f32 %v564_v3, %v564_v3 }
  0x46   : > { %v318_v7 = vmul.f32 %v576_v43, %v576_v43 }
  0x47   : > { %v260_v0 = vadd.f32 %v259_v55, %v258_v57  ;;  %v357_v40 = vadd.f32 %v356_v33, %v355_v35  ;;  %v366_v57 = vsel %vm215_vm0, %v311_v49, 0.0  ;;  %v368_v60 = vsel %vm215_vm0, %v312_v51, 0.0 }
  0x48   : > { %v380_v18 = vsel %vm215_vm0, %v318_v7, 0.0 }
  0x49   : > { %v262_v6 = vadd.f32 %v261_v61, %v260_v0  ;;  %v359_v46 = vadd.f32 %v358_v39, %v357_v40  ;;  %v314_v61 = vmul.f32 %v568_v16, %v568_v16  ;;  %v370_v0 = vsel %vm215_vm0, %v313_v52, 0.0 }
  0x4a   : > { %v378_v16 = vsel %vm215_vm0, %v317_v8, 0.0 }
  0x4b   : > { %v264_v13 = vadd.f32 %v263_v4, %v262_v6  ;;  %v361_v47 = vadd.f32 %v360_v45, %v359_v46  ;;  %v316_v4 = vmul.f32 %v572_v30, %v572_v30  ;;  %v372_v5 = vsel %vm215_vm0, %v314_v61, 0.0 }
  0x4d   : > { %v266_v19 = vadd.f32 %v265_v10, %v264_v13  ;;  %v363_v56 = vadd.f32 %v362_v42, %v361_v47  ;;  %v376_v12 = vsel %vm215_vm0, %v316_v4, 0.0 }
  0x4f   : > { %v268_v26 = vadd.f32 %v267_v17, %v266_v19  ;;  %v365_v59 = vadd.f32 %v364_v53, %v363_v56 }
  0x51   : > { %v270_v27 = vadd.f32 %v269_v23, %v268_v26  ;;  %v367_v58 = vadd.f32 %v366_v57, %v365_v59 }
  0x53   : > { %v272_v34 = vadd.f32 %v271_v29, %v270_v27  ;;  %v369_v3 = vadd.f32 %v368_v60, %v367_v58 }
  0x55   : > { %v274_v41 = vadd.f32 %v273_v31, %v272_v34  ;;  %v371_v6 = vadd.f32 %v370_v0, %v369_v3 }
  0x57   : > { %v276_v50 = vadd.f32 %v275_v44, %v274_v41  ;;  %v373_v11 = vadd.f32 %v372_v5, %v371_v6 }
  0x59   : > { %v278_v55 = vadd.f32 %v277_v48, %v276_v50  ;;  %v375_v15 = vadd.f32 %v374_v9, %v373_v11 }
  0x5b   : > { %v279_v54 = vrot.slane %v278_v55, 4  ;;  %v377_v17 = vadd.f32 %v376_v12, %v375_v15 }
  0x5d   : > { %v280_v62 = vadd.f32 %v279_v54, %v278_v55 }
  0x5f   : > { %v281_v2 = vrot.slane %v280_v62, 2 }
  0x61   : > { %v282_v1 = vadd.f32 %v281_v2, %v280_v62 }
  0x63   : > { %v283_v10 = vrot.slane %v282_v1, 1 }
  0x65   : > { %v284_v13 = vadd.f32 %v283_v10, %v282_v1 }
  0x67   : > { %286 = vst.msk [vmem:[%s139_s27] sm:$0x1] %vm285_vm1, %v284_v13 }
  0x68   : > { %649 = shalt.err (!%p646_p3)
}
  0x69   : > { %s650_s16 = scalar_lea.hbm %s890_s4, 16  ;;  %s654_s22 = scalar_lea.hbm %s960_s1, 32 }
  0x6a   : > { %p651_p4 = scmp.ne.s32.totalorder %s890_s4, %s650_s16  ;;  %p655_p9 = scmp.lt.s32.totalorder %s890_s4, %s960_s1 }
  0x6b   : > { %p656_p10 = scmp.lt.s32.totalorder %s654_s22, %s650_s16 }
  0x6c   : > { %p652_p7 = pnand %p651_p4, %p783_p5 }
  0x6d   : > { %p657_p11 = por %p656_p10, %p655_p9 }
  0x6e   : > { %p653_p8 = pneg %p652_p7 }
  0x70   : > { %p658_p12 = pnand %p657_p11, %p653_p8 }
  0x72   : > { %661 = shalt.err (!%p658_p12)
}
  0x73   : > { %592 = dma.vmem_to_hbm [thread:$0]  (%p783_p5), %s882_s28, 16, %s890_s4, %s390_s5   ;;  %v379_v14 = vadd.f32 %v378_v16, %v377_v17 }
  0x74   : > { %s145_s25 = scalar_lea.vmem [#allocation4], %s874_s26  ;;  %s417_s28 = scalar_lea.hbm %s961_s2, %s508_s29 }
  0x75   : > { %v381_v19 = vadd.f32 %v380_v18, %v379_v14  ;;  %s419_s27 = sshll.u32 %s145_s25, 4  ;;  %s394_s4 = scalar_lea.sflag [#allocation5], %s874_s26  ;;  %s917_s27 = int_to_ptr.vmem [resolvable:$true] %s419_s27 }
  0x76   : > { %s662_s5 = scalar_lea.vmem %s917_s27, 16  ;;  %s729_s6 = smov [#allocation4]  }
  0x77   : > { %v382_v21 = vrot.slane %v381_v19, 4  ;;  %p663_p13 = scmp.ne.s32.totalorder %s917_s27, %s662_s5  ;;  %s666_s7 = sshll.u32 %s729_s6, 4  ;;  %s667_s7 = int_to_ptr.vmem [resolvable:$false] %s666_s7 }
  0x78   : > { %s668_s8 = scalar_lea.vmem %s667_s7, 32  ;;  %p669_p2 = scmp.lt.s32.totalorder %s917_s27, %s667_s7 }
  0x79   : > { %v383_v22 = vadd.f32 %v382_v21, %v381_v19  ;;  %p664_p0 = pnand %p663_p13, %p783_p5  ;;  %p670_p3 = scmp.lt.s32.totalorder %s668_s8, %s662_s5 }
  0x7b   : > { %v384_v23 = vrot.slane %v383_v22, 2  ;;  %p665_p1 = pneg %p664_p0  ;;  %p671_p4 = por %p670_p3, %p669_p2 }
  0x7d   : > { %v385_v24 = vadd.f32 %v384_v23, %v383_v22  ;;  %p672_p7 = pnand %p671_p4, %p665_p1 }
  0x7f   : > { %v386_v25 = vrot.slane %v385_v24, 1 }
  0x81   : > { %v387_v20 = vadd.f32 %v386_v25, %v385_v24 }
  0x83   : > { %388 = vst.msk [vmem:[%s145_s25] sm:$0x1] %vm285_vm1, %v387_v20 }
  0x84   : > { %675 = shalt.err (!%p672_p7)
}
  0x85   : > { %s676_s13 = scalar_lea.hbm %s417_s28, 16  ;;  %s680_s14 = scalar_lea.hbm %s961_s2, 32 }
  0x86   : > { %p677_p8 = scmp.ne.s32.totalorder %s417_s28, %s676_s13  ;;  %p681_p11 = scmp.lt.s32.totalorder %s417_s28, %s961_s2 }
  0x87   : > { %p682_p12 = scmp.lt.s32.totalorder %s680_s14, %s676_s13 }
  0x88   : > { %p678_p9 = pnand %p677_p8, %p783_p5 }
  0x89   : > { %p683_p13 = por %p682_p12, %p681_p11 }
  0x8a   : > { %p679_p10 = pneg %p678_p9 }
  0x8c   : > { %p684_p0 = pnand %p683_p13, %p679_p10 }
  0x8e   : > { %687 = shalt.err (!%p684_p0)
}
  0x8f   : > { %593 = dma.vmem_to_hbm [thread:$0]  (%p783_p5), %s917_s27, 16, %s417_s28, %s394_s4  }
  0x90 PF: > { %p603_p1 = scmp.ge.s32.totalorder %s726_s12, 2  ;;  %s431_s21 = sand.u32 1, %s714_s9  }
  0x91   : > { %s432_s22 = scalar_lea.sflag [#allocation3], %s431_s21 }
  0x92   : > { %p597_p2 = pnand %p603_p1, %p787_p6 }
  0x94   : > { %p598_p3 = pneg %p597_p2 }
  0x96   : > { %705 = dma.done.wait (%p598_p3), %s432_s22, 16  }
  0x97   : > { %707 = vsyncadd (%p598_p3), %s432_s22, 4294967280  ;;  %s440_s23 = scalar_lea.sflag [#allocation5], %s431_s21 }
  0x98   : > { %709 = dma.done.wait (%p598_p3), %s440_s23, 16  }
  0x99   : > { %711 = vsyncadd (%p598_p3), %s440_s23, 4294967280  ;;  %p16_p5 = scmp.ge.s32.totalorder %s770_s15, 4   ;;  %s964_s9 = smov %s718_s10 }
  0x9a   : > { %s965_s10 = smov %s722_s11  ;;  %s966_s11 = smov %s781_s18 }
  0x9b   : > { %s967_s12 = smov %s770_s15  ;;  %18 = sbr.rel (!%p16_p5) target bundleno = 5 (0x5), region = 76 }
  0xa0   :  { %444 = vsyncpa [#allocation3], 1 }
  0xa1   :  { %446 = vsyncpa [#allocation3 + $0x1], 1 }
  0xa2   :  { %447 = vsyncpa [#allocation5], 1 }
  0xa3   :  { %449 = vsyncpa [#allocation5 + $0x1], 1 }

</bundles_post_ra>
